<compile_context>
chip_gen: v7x
topology: tpu7x:2x2x1
jax: 0.10.0
libtpu: 0.0.40
codegen_flags: <defaults>
</compile_context>

<pallas_src>
import functools

import jax
import jax.numpy as jnp
from jax.experimental import pallas as pl
from jax.experimental.pallas import tpu as pltpu

_LANE = 128


def _round_up(x, m):
    return (x + m - 1) // m * m


def _rnn_kernel(obs_ref, hin_ref,
                w1_ref, b1_ref,
                wrz_ref, brz_ref,
                win_ref, bin_ref,
                whn_ref, bhn_ref,
                w2_ref, b2_ref,
                q_ref, hout_ref,
                *, hidden_dim):
    """One batch tile: fc1 -> ReLU -> GRUCell -> fc2 (PyTorch gate order r,z,n)."""
    H = hidden_dim                      # padded hidden width (multiple of 128)
    cdt = w1_ref.dtype                  # MXU operand dtype (bf16 or f32)

    # ---- fc1 + ReLU (f32 accumulation, f32 VPU math) ----
    x = jnp.dot(obs_ref[...], w1_ref[...], preferred_element_type=jnp.float32)
    x = jnp.maximum(x + b1_ref[...], 0.0)

    h_in = hin_ref[...]                 # f32 (recurrent state kept in f32)
    x_c = x.astype(cdt)
    h_c = h_in.astype(cdt)

    # ---- GRUCell ----
    # r/z pre-activation accumulated entirely in the MXU:
    #   [x, h] @ [[W_ih_rz], [W_hh_rz]]  ==  x @ W_ih_rz + h @ W_hh_rz
    xh = jnp.concatenate([x_c, h_c], axis=-1)                      # [bb, 2H]
    rz = jax.nn.sigmoid(
        jnp.dot(xh, wrz_ref[...], preferred_element_type=jnp.float32)
        + brz_ref[...])                                            # [bb, 2H]
    r = rz[:, :H]
    z = rz[:, H:]

    # n gate keeps separate ih/hh biases (PyTorch nn.GRUCell semantics).
    gi_n = jnp.dot(x_c, win_ref[...], preferred_element_type=jnp.float32)
    gh_n = jnp.dot(h_c, whn_ref[...], preferred_element_type=jnp.float32)
    n = jnp.tanh(gi_n + bin_ref[...] + r * (gh_n + bhn_ref[...]))

    h_new = (1.0 - z) * n + z * h_in
    hout_ref[...] = h_new

    # ---- fc2 (lane-dense padded output) ----
    q_ref[...] = (jnp.dot(h_new.astype(cdt), w2_ref[...],
                          preferred_element_type=jnp.float32) + b2_ref[...])


def make_rnn(input_shape, rnn_hidden_dim, n_actions, *,
             weight_dtype=jnp.bfloat16, block_b=1024):
    """Returns (prepare_params, forward).

    prepare_params(params) -> prep : pads + casts weights ONCE (call it outside
        the per-step hot loop and reuse `prep` across forward calls).
    forward(obs, hidden_state, prep, ...) -> (q [B, n_actions], h [B, H]).
    """
    D, H, A = int(input_shape), int(rnn_hidden_dim), int(n_actions)
    Dp, Hp, Ap = _round_up(D, _LANE), _round_up(H, _LANE), _round_up(A, _LANE)
    f32 = jnp.float32

    def prepare_params(params):
        w1, b1 = params["w1"], params["b1"]
        wih, bih = params["w_ih"], params["b_ih"].reshape(1, -1)
        whh, bhh = params["w_hh"], params["b_hh"].reshape(1, -1)
        w2, b2 = params["w2"], params["b2"]

        w1p = jnp.zeros((Dp, Hp), f32).at[:D, :H].set(w1)
        w2p = jnp.zeros((Hp, Ap), f32).at[:H, :A].set(w2)

        # r/z gate weights of W_ih / W_hh stacked row-wise so concat([x, h])
        # against them accumulates gi_rz + gh_rz inside the MXU.
        wrz = jnp.zeros((2 * Hp, 2 * Hp), f32)
        wrz = wrz.at[:H, :H].set(wih[:, 0:H])                       # x -> r
        wrz = wrz.at[:H, Hp:Hp + H].set(wih[:, H:2 * H])            # x -> z
        wrz = wrz.at[Hp:Hp + H, :H].set(whh[:, 0:H])                # h -> r
        wrz = wrz.at[Hp:Hp + H, Hp:Hp + H].set(whh[:, H:2 * H])     # h -> z

        win = jnp.zeros((Hp, Hp), f32).at[:H, :H].set(wih[:, 2 * H:])
        whn = jnp.zeros((Hp, Hp), f32).at[:H, :H].set(whh[:, 2 * H:])

        b1p = jnp.zeros((1, Hp), f32).at[:, :H].set(b1.reshape(1, -1))
        b2p = jnp.zeros((1, Ap), f32).at[:, :A].set(b2.reshape(1, -1))
        # r/z biases pre-folded (ih + hh).  Padded lanes stay exactly 0 so the
        # padded lanes of h_out come out as 0 -- keep this invariant.
        brz = jnp.zeros((1, 2 * Hp), f32)
        brz = brz.at[:, :H].set(bih[:, 0:H] + bhh[:, 0:H])
        brz = brz.at[:, Hp:Hp + H].set(bih[:, H:2 * H] + bhh[:, H:2 * H])
        b_in = jnp.zeros((1, Hp), f32).at[:, :H].set(bih[:, 2 * H:])
        b_hn = jnp.zeros((1, Hp), f32).at[:, :H].set(bhh[:, 2 * H:])

        return {
            "w1": w1p.astype(weight_dtype), "b1": b1p,
            "w_rz": wrz.astype(weight_dtype), "b_rz": brz,
            "w_in": win.astype(weight_dtype), "b_in": b_in,
            "w_hn": whn.astype(weight_dtype), "b_hn": b_hn,
            "w2": w2p.astype(weight_dtype), "b2": b2p,
        }

    def forward(obs, hidden_state, prep, *, with_comm=False, msgs=None,
                agent_num=None, msg_i=None):
        if with_comm and agent_num is not None:
            # Glue: message concat (clone/detach == stop_gradient).  The
            # input_shape given to make_rnn must already include the msg dims.
            msgs = jax.lax.stop_gradient(msgs)
            obs = jnp.concatenate([obs, msgs.reshape(obs.shape[0], -1)], axis=-1)
            obs = jnp.concatenate([obs, msg_i.reshape(obs.shape[0], -1)], axis=-1)

        cdt = weight_dtype
        B = obs.shape[0]

        # Batch tiling: round B up to 8 sublanes first, then split into
        # ceil(B8/block_b) near-equal tiles so padded rows stay < 8*num_tiles.
        B8 = _round_up(max(B, 1), 8)
        nt = max(1, (B8 + block_b - 1) // block_b)
        bb = _round_up((B8 + nt - 1) // nt, 8)
        Bp = nt * bb

        # obs cast to the MXU operand dtype at the HBM boundary (bf16 in the
        # perf path); skip the zero-pad copy entirely when already aligned.
        if Bp == B and Dp == D:
            obs_p = obs.astype(cdt)
        else:
            obs_p = jnp.zeros((Bp, Dp), cdt).at[:B, :D].set(obs.astype(cdt))

        h_in = hidden_state.reshape(-1, H)
        if Bp == B and Hp == H:
            h_p = h_in.astype(f32)
        else:
            h_p = jnp.zeros((Bp, Hp), f32).at[:B, :H].set(h_in.astype(f32))

        kernel = functools.partial(_rnn_kernel, hidden_dim=Hp)
        row = lambda i: (i, 0)      # batch-tiled operands
        const = lambda i: (0, 0)    # VMEM-resident weights (no re-DMA per step)

        q_p, h_out_p = pl.pallas_call(
            kernel,
            out_shape=(
                jax.ShapeDtypeStruct((Bp, Ap), f32),
                jax.ShapeDtypeStruct((Bp, Hp), f32),
            ),
            grid_spec=pltpu.PrefetchScalarGridSpec(
                num_scalar_prefetch=0,
                grid=(Bp // bb,),
                in_specs=[
                    pl.BlockSpec((bb, Dp), row),            # obs
                    pl.BlockSpec((bb, Hp), row),            # h_in
                    pl.BlockSpec((Dp, Hp), const),          # w1
                    pl.BlockSpec((1, Hp), const),           # b1
                    pl.BlockSpec((2 * Hp, 2 * Hp), const),  # w_rz (stacked)
                    pl.BlockSpec((1, 2 * Hp), const),       # b_rz (folded)
                    pl.BlockSpec((Hp, Hp), const),          # w_ih_n
                    pl.BlockSpec((1, Hp), const),           # b_ih_n
                    pl.BlockSpec((Hp, Hp), const),          # w_hh_n
                    pl.BlockSpec((1, Hp), const),           # b_hh_n
                    pl.BlockSpec((Hp, Ap), const),          # w2
                    pl.BlockSpec((1, Ap), const),           # b2
                ],
                out_specs=(
                    pl.BlockSpec((bb, Ap), row),            # q (lane-dense)
                    pl.BlockSpec((bb, Hp), row),            # h_out
                ),
            ),
            compiler_params=pltpu.CompilerParams(
                dimension_semantics=("parallel",),
                vmem_limit_bytes=48 * 1024 * 1024,
            ),
            input_output_aliases={1: 1},   # h_in HBM buffer reused for h_out
        )(obs_p, h_p, prep["w1"], prep["b1"], prep["w_rz"], prep["b_rz"],
          prep["w_in"], prep["b_in"], prep["w_hn"], prep["b_hn"],
          prep["w2"], prep["b2"])

        q = q_p if (Bp == B and Ap == A) else q_p[:B, :A]
        h = h_out_p if (Bp == B and Hp == H) else h_out_p[:B, :H]
        return q, h

    return prepare_params, forward


def init_params(key, input_shape, rnn_hidden_dim, n_actions):
    """Deterministic parameter init (uniform ±1/sqrt(fan_in), PyTorch-style).

    Linear weights stored pre-transposed as [in_features, out_features]; GRU
    gates concatenated in PyTorch order (r, z, n)."""
    ks = jax.random.split(key, 8)
    H = rnn_hidden_dim

    def u(k, shape, fan_in):
        bound = 1.0 / jnp.sqrt(fan_in)
        return jax.random.uniform(k, shape, jnp.float32, -bound, bound)

    return {
        "w1": u(ks[0], (input_shape, H), input_shape),
        "b1": u(ks[1], (1, H), input_shape),
        "w_ih": u(ks[2], (H, 3 * H), H),
        "b_ih": u(ks[3], (1, 3 * H), H),
        "w_hh": u(ks[4], (H, 3 * H), H),
        "b_hh": u(ks[5], (1, 3 * H), H),
        "w2": u(ks[6], (H, n_actions), H),
        "b2": u(ks[7], (1, n_actions), H),
    }


def rnn_forward_ref(obs, hidden_state, params):
    """Pure-JAX reference (PyTorch nn.GRUCell semantics) for correctness check."""
    H = params["w1"].shape[1]
    x = jnp.maximum(obs @ params["w1"] + params["b1"], 0.0)
    h_in = hidden_state.reshape(-1, H)
    gi = x @ params["w_ih"] + params["b_ih"]
    gh = h_in @ params["w_hh"] + params["b_hh"]
    i_r, i_z, i_n = gi[:, :H], gi[:, H:2 * H], gi[:, 2 * H:]
    h_r, h_z, h_n = gh[:, :H], gh[:, H:2 * H], gh[:, 2 * H:]
    r = jax.nn.sigmoid(i_r + h_r)
    z = jax.nn.sigmoid(i_z + h_z)
    n = jnp.tanh(i_n + r * h_n)
    h = (1.0 - z) * n + z * h_in
    q = h @ params["w2"] + params["b2"]
    return q, h


if __name__ == "__main__":
    # Small, forward-consistent shapes: 2 envs x 4 agents = batch 8.
    batch = 8
    input_shape = 24          # obs feature dim fed to fc1
    rnn_hidden_dim = 32
    n_actions = 6

    key = jax.random.PRNGKey(0)
    k_params, k_obs, k_h = jax.random.split(key, 3)

    params = init_params(k_params, input_shape, rnn_hidden_dim, n_actions)
    obs = jax.random.normal(k_obs, (batch, input_shape), jnp.float32)
    hidden_state = jax.random.normal(k_h, (batch, rnn_hidden_dim), jnp.float32)

    q_ref, h_ref = rnn_forward_ref(obs, hidden_state, params)

    # --- exact-semantics check: f32 MXU operands, tight tolerance ---
    prep32_fn, fwd32 = make_rnn(input_shape, rnn_hidden_dim, n_actions,
                                weight_dtype=jnp.float32)
    prep32 = prep32_fn(params)            # pad/cast once, outside the hot loop
    q32, h32 = jax.jit(fwd32)(obs, hidden_state, prep32)
    jax.block_until_ready((q32, h32))
    assert q32.shape == (batch, n_actions) and h32.shape == (batch, rnn_hidden_dim)
    assert jnp.allclose(q32, q_ref, atol=1e-5, rtol=1e-5)
    assert jnp.allclose(h32, h_ref, atol=1e-5, rtol=1e-5)

    # --- perf path: bf16 MXU operands / bf16 obs at the HBM boundary,
    #     f32 accumulation, f32 gate math, f32 recurrent state ---
    prep16_fn, fwd16 = make_rnn(input_shape, rnn_hidden_dim, n_actions)
    prep16 = prep16_fn(params)
    qb, hb = jax.jit(fwd16)(obs, hidden_state, prep16)
    jax.block_until_ready((qb, hb))

    params_rounded = {k: (v.astype(jnp.bfloat16).astype(jnp.float32)
                          if k.startswith("w") else v)
                      for k, v in params.items()}
    obs_rounded = obs.astype(jnp.bfloat16).astype(jnp.float32)
    q_refb, h_refb = rnn_forward_ref(obs_rounded, hidden_state, params_rounded)
    assert jnp.allclose(qb, q_refb, atol=3e-2, rtol=0)
    assert jnp.allclose(hb, h_refb, atol=3e-2, rtol=0)

    print("KERNEL_OK")
</pallas_src>

<mosaic_0001>
module attributes {stable_mosaic.version = 11 : i64} {
  func.func @_rnn_kernel(%arg0: i32, %arg1: memref<8x128xf32, #tpu.memory_space<vmem>>, %arg2: memref<8x128xf32, #tpu.memory_space<vmem>>, %arg3: memref<128x128xf32, #tpu.memory_space<vmem>>, %arg4: memref<1x128xf32, #tpu.memory_space<vmem>>, %arg5: memref<256x256xf32, #tpu.memory_space<vmem>>, %arg6: memref<1x256xf32, #tpu.memory_space<vmem>>, %arg7: memref<128x128xf32, #tpu.memory_space<vmem>>, %arg8: memref<1x128xf32, #tpu.memory_space<vmem>>, %arg9: memref<128x128xf32, #tpu.memory_space<vmem>>, %arg10: memref<1x128xf32, #tpu.memory_space<vmem>>, %arg11: memref<128x128xf32, #tpu.memory_space<vmem>>, %arg12: memref<1x128xf32, #tpu.memory_space<vmem>>, %arg13: memref<8x128xf32, #tpu.memory_space<vmem>>, %arg14: memref<8x128xf32, #tpu.memory_space<vmem>>) attributes {dimension_semantics = [#tpu.dimension_semantics<parallel>], iteration_bounds = array<i64: 1>, scalar_prefetch = 0 : i64, scratch_operands = 0 : i64, tpu.core_type = #tpu.core_type<tc>, window_params = [{transform_indices = @transform_0, window_bounds = array<i64: 8, 128>}, {transform_indices = @transform_1, window_bounds = array<i64: 8, 128>}, {pipeline_mode = #tpu.pipeline_mode<synchronous>, transform_indices = @transform_2, window_bounds = array<i64: 128, 128>}, {pipeline_mode = #tpu.pipeline_mode<synchronous>, transform_indices = @transform_3, window_bounds = array<i64: 1, 128>}, {pipeline_mode = #tpu.pipeline_mode<synchronous>, transform_indices = @transform_4, window_bounds = array<i64: 256, 256>}, {pipeline_mode = #tpu.pipeline_mode<synchronous>, transform_indices = @transform_5, window_bounds = array<i64: 1, 256>}, {pipeline_mode = #tpu.pipeline_mode<synchronous>, transform_indices = @transform_6, window_bounds = array<i64: 128, 128>}, {pipeline_mode = #tpu.pipeline_mode<synchronous>, transform_indices = @transform_7, window_bounds = array<i64: 1, 128>}, {pipeline_mode = #tpu.pipeline_mode<synchronous>, transform_indices = @transform_8, window_bounds = array<i64: 128, 128>}, {pipeline_mode = #tpu.pipeline_mode<synchronous>, transform_indices = @transform_9, window_bounds = array<i64: 1, 128>}, {pipeline_mode = #tpu.pipeline_mode<synchronous>, transform_indices = @transform_10, window_bounds = array<i64: 128, 128>}, {pipeline_mode = #tpu.pipeline_mode<synchronous>, transform_indices = @transform_11, window_bounds = array<i64: 1, 128>}, {transform_indices = @transform_12, window_bounds = array<i64: 8, 128>}, {transform_indices = @transform_13, window_bounds = array<i64: 8, 128>}]} {
    %c0 = arith.constant 0 : index
    %c0_0 = arith.constant 0 : index
    %0 = vector.load %arg1[%c0, %c0_0] : memref<8x128xf32, #tpu.memory_space<vmem>>, vector<8x128xf32>
    %c0_1 = arith.constant 0 : index
    %c0_2 = arith.constant 0 : index
    %1 = vector.load %arg3[%c0_1, %c0_2] : memref<128x128xf32, #tpu.memory_space<vmem>>, vector<128x128xf32>
    %cst = arith.constant dense<0.000000e+00> : vector<8x128xf32>
    %2 = tpu.matmul %0, %1, %cst {dimension_numbers = #tpu.dot_dimension_numbers<[1], [0], [0], [1], [0, 0, 1, 1], [], []>} : vector<8x128xf32>, vector<128x128xf32>, vector<8x128xf32> -> vector<8x128xf32>
    %c0_3 = arith.constant 0 : index
    %c0_4 = arith.constant 0 : index
    %3 = vector.load %arg4[%c0_3, %c0_4] : memref<1x128xf32, #tpu.memory_space<vmem>>, vector<1x128xf32>
    %4 = vector.broadcast %3 : vector<1x128xf32> to vector<8x128xf32>
    %5 = arith.addf %2, %4 : vector<8x128xf32>
    %cst_5 = arith.constant 0.000000e+00 : f32
    %6 = vector.broadcast %cst_5 : f32 to vector<8x128xf32>
    %7 = arith.maximumf %5, %6 : vector<8x128xf32>
    %c0_6 = arith.constant 0 : index
    %c0_7 = arith.constant 0 : index
    %8 = vector.load %arg2[%c0_6, %c0_7] : memref<8x128xf32, #tpu.memory_space<vmem>>, vector<8x128xf32>
    %9 = tpu.concatenate %7, %8 in 1 : vector<8x128xf32>, vector<8x128xf32> -> vector<8x256xf32>
    %c0_8 = arith.constant 0 : index
    %c0_9 = arith.constant 0 : index
    %10 = vector.load %arg5[%c0_8, %c0_9] : memref<256x256xf32, #tpu.memory_space<vmem>>, vector<256x256xf32>
    %cst_10 = arith.constant dense<0.000000e+00> : vector<8x256xf32>
    %11 = tpu.matmul %9, %10, %cst_10 {dimension_numbers = #tpu.dot_dimension_numbers<[1], [0], [0], [1], [0, 0, 1, 1], [], []>} : vector<8x256xf32>, vector<256x256xf32>, vector<8x256xf32> -> vector<8x256xf32>
    %c0_11 = arith.constant 0 : index
    %c0_12 = arith.constant 0 : index
    %12 = vector.load %arg6[%c0_11, %c0_12] : memref<1x256xf32, #tpu.memory_space<vmem>>, vector<1x256xf32>
    %13 = vector.broadcast %12 : vector<1x256xf32> to vector<8x256xf32>
    %14 = arith.addf %11, %13 : vector<8x256xf32>
    %15 = arith.negf %14 : vector<8x256xf32>
    %16 = math.exp %15 : vector<8x256xf32>
    %cst_13 = arith.constant 1.000000e+00 : f32
    %17 = vector.broadcast %cst_13 : f32 to vector<8x256xf32>
    %18 = arith.addf %17, %16 : vector<8x256xf32>
    %19 = arith.divf %17, %18 : vector<8x256xf32>
    %20 = vector.extract_strided_slice %19 {offsets = [0, 0], sizes = [8, 128], strides = [1, 1]} : vector<8x256xf32> to vector<8x128xf32>
    %21 = vector.extract_strided_slice %19 {offsets = [0, 128], sizes = [8, 128], strides = [1, 1]} : vector<8x256xf32> to vector<8x128xf32>
    %c0_14 = arith.constant 0 : index
    %c0_15 = arith.constant 0 : index
    %22 = vector.load %arg7[%c0_14, %c0_15] : memref<128x128xf32, #tpu.memory_space<vmem>>, vector<128x128xf32>
    %cst_16 = arith.constant dense<0.000000e+00> : vector<8x128xf32>
    %23 = tpu.matmul %7, %22, %cst_16 {dimension_numbers = #tpu.dot_dimension_numbers<[1], [0], [0], [1], [0, 0, 1, 1], [], []>} : vector<8x128xf32>, vector<128x128xf32>, vector<8x128xf32> -> vector<8x128xf32>
    %c0_17 = arith.constant 0 : index
    %c0_18 = arith.constant 0 : index
    %24 = vector.load %arg9[%c0_17, %c0_18] : memref<128x128xf32, #tpu.memory_space<vmem>>, vector<128x128xf32>
    %cst_19 = arith.constant dense<0.000000e+00> : vector<8x128xf32>
    %25 = tpu.matmul %8, %24, %cst_19 {dimension_numbers = #tpu.dot_dimension_numbers<[1], [0], [0], [1], [0, 0, 1, 1], [], []>} : vector<8x128xf32>, vector<128x128xf32>, vector<8x128xf32> -> vector<8x128xf32>
    %c0_20 = arith.constant 0 : index
    %c0_21 = arith.constant 0 : index
    %26 = vector.load %arg8[%c0_20, %c0_21] : memref<1x128xf32, #tpu.memory_space<vmem>>, vector<1x128xf32>
    %27 = vector.broadcast %26 : vector<1x128xf32> to vector<8x128xf32>
    %28 = arith.addf %23, %27 : vector<8x128xf32>
    %c0_22 = arith.constant 0 : index
    %c0_23 = arith.constant 0 : index
    %29 = vector.load %arg10[%c0_22, %c0_23] : memref<1x128xf32, #tpu.memory_space<vmem>>, vector<1x128xf32>
    %30 = vector.broadcast %29 : vector<1x128xf32> to vector<8x128xf32>
    %31 = arith.addf %25, %30 : vector<8x128xf32>
    %32 = arith.mulf %20, %31 : vector<8x128xf32>
    %33 = arith.addf %28, %32 : vector<8x128xf32>
    %34 = math.tanh %33 : vector<8x128xf32>
    %cst_24 = arith.constant 1.000000e+00 : f32
    %35 = vector.broadcast %cst_24 : f32 to vector<8x128xf32>
    %36 = arith.subf %35, %21 : vector<8x128xf32>
    %37 = arith.mulf %36, %34 : vector<8x128xf32>
    %38 = arith.mulf %21, %8 : vector<8x128xf32>
    %39 = arith.addf %37, %38 : vector<8x128xf32>
    %c0_25 = arith.constant 0 : index
    %c0_26 = arith.constant 0 : index
    %40 = vector.load %arg14[%c0_25, %c0_26] : memref<8x128xf32, #tpu.memory_space<vmem>>, vector<8x128xf32>
    tpu.vector_store %arg14[%c0_25, %c0_26], %39 {strides = array<i32>} : memref<8x128xf32, #tpu.memory_space<vmem>>, vector<8x128xf32>,
    %c0_27 = arith.constant 0 : index
    %c0_28 = arith.constant 0 : index
    %41 = vector.load %arg11[%c0_27, %c0_28] : memref<128x128xf32, #tpu.memory_space<vmem>>, vector<128x128xf32>
    %cst_29 = arith.constant dense<0.000000e+00> : vector<8x128xf32>
    %42 = tpu.matmul %39, %41, %cst_29 {dimension_numbers = #tpu.dot_dimension_numbers<[1], [0], [0], [1], [0, 0, 1, 1], [], []>} : vector<8x128xf32>, vector<128x128xf32>, vector<8x128xf32> -> vector<8x128xf32>
    %c0_30 = arith.constant 0 : index
    %c0_31 = arith.constant 0 : index
    %43 = vector.load %arg12[%c0_30, %c0_31] : memref<1x128xf32, #tpu.memory_space<vmem>>, vector<1x128xf32>
    %44 = vector.broadcast %43 : vector<1x128xf32> to vector<8x128xf32>
    %45 = arith.addf %42, %44 : vector<8x128xf32>
    %c0_32 = arith.constant 0 : index
    %c0_33 = arith.constant 0 : index
    %46 = vector.load %arg13[%c0_32, %c0_33] : memref<8x128xf32, #tpu.memory_space<vmem>>, vector<8x128xf32>
    tpu.vector_store %arg13[%c0_32, %c0_33], %45 {strides = array<i32>} : memref<8x128xf32, #tpu.memory_space<vmem>>, vector<8x128xf32>,
    return
  }
  func.func @transform_0(%arg0: i32) -> (i32, i32) {
    %c0_i32 = arith.constant 0 : i32
    %c0_i32_0 = arith.constant 0 : i32
    return %arg0, %c0_i32 : i32, i32
  }
  func.func @transform_1(%arg0: i32) -> (i32, i32) {
    %c0_i32 = arith.constant 0 : i32
    %c0_i32_0 = arith.constant 0 : i32
    return %arg0, %c0_i32 : i32, i32
  }
  func.func @transform_2(%arg0: i32) -> (i32, i32) {
    %c0_i32 = arith.constant 0 : i32
    %c0_i32_0 = arith.constant 0 : i32
    %c0_i32_1 = arith.constant 0 : i32
    return %c0_i32, %c0_i32_0 : i32, i32
  }
  func.func @transform_3(%arg0: i32) -> (i32, i32) {
    %c0_i32 = arith.constant 0 : i32
    %c0_i32_0 = arith.constant 0 : i32
    %c0_i32_1 = arith.constant 0 : i32
    return %c0_i32, %c0_i32_0 : i32, i32
  }
  func.func @transform_4(%arg0: i32) -> (i32, i32) {
    %c0_i32 = arith.constant 0 : i32
    %c0_i32_0 = arith.constant 0 : i32
    %c0_i32_1 = arith.constant 0 : i32
    return %c0_i32, %c0_i32_0 : i32, i32
  }
  func.func @transform_5(%arg0: i32) -> (i32, i32) {
    %c0_i32 = arith.constant 0 : i32
    %c0_i32_0 = arith.constant 0 : i32
    %c0_i32_1 = arith.constant 0 : i32
    return %c0_i32, %c0_i32_0 : i32, i32
  }
  func.func @transform_6(%arg0: i32) -> (i32, i32) {
    %c0_i32 = arith.constant 0 : i32
    %c0_i32_0 = arith.constant 0 : i32
    %c0_i32_1 = arith.constant 0 : i32
    return %c0_i32, %c0_i32_0 : i32, i32
  }
  func.func @transform_7(%arg0: i32) -> (i32, i32) {
    %c0_i32 = arith.constant 0 : i32
    %c0_i32_0 = arith.constant 0 : i32
    %c0_i32_1 = arith.constant 0 : i32
    return %c0_i32, %c0_i32_0 : i32, i32
  }
  func.func @transform_8(%arg0: i32) -> (i32, i32) {
    %c0_i32 = arith.constant 0 : i32
    %c0_i32_0 = arith.constant 0 : i32
    %c0_i32_1 = arith.constant 0 : i32
    return %c0_i32, %c0_i32_0 : i32, i32
  }
  func.func @transform_9(%arg0: i32) -> (i32, i32) {
    %c0_i32 = arith.constant 0 : i32
    %c0_i32_0 = arith.constant 0 : i32
    %c0_i32_1 = arith.constant 0 : i32
    return %c0_i32, %c0_i32_0 : i32, i32
  }
  func.func @transform_10(%arg0: i32) -> (i32, i32) {
    %c0_i32 = arith.constant 0 : i32
    %c0_i32_0 = arith.constant 0 : i32
    %c0_i32_1 = arith.constant 0 : i32
    return %c0_i32, %c0_i32_0 : i32, i32
  }
  func.func @transform_11(%arg0: i32) -> (i32, i32) {
    %c0_i32 = arith.constant 0 : i32
    %c0_i32_0 = arith.constant 0 : i32
    %c0_i32_1 = arith.constant 0 : i32
    return %c0_i32, %c0_i32_0 : i32, i32
  }
  func.func @transform_12(%arg0: i32) -> (i32, i32) {
    %c0_i32 = arith.constant 0 : i32
    %c0_i32_0 = arith.constant 0 : i32
    return %arg0, %c0_i32 : i32, i32
  }
  func.func @transform_13(%arg0: i32) -> (i32, i32) {
    %c0_i32 = arith.constant 0 : i32
    %c0_i32_0 = arith.constant 0 : i32
    return %arg0, %c0_i32 : i32, i32
  }
}

</mosaic_0001>

<bundles_post_ra>
// kernel: forward.1
= control target key start
LH: loop header
LB: loop body
LE: loop exit
PB: predicated region body
PF: predicated region fallthrough
CT: control target
= control target key end

     0   :  { %19 = vsyncpa [#allocation3], 0  ;;  %s1449_s0 = inlined_call_operand.vmem [shape: f32[8,128], index: 0, kind: input, shape index: {}]   ;;  %s1450_s1 = inlined_call_operand.vmem [shape: f32[8,128], index: 1, kind: input, shape index: {}, may-alias: {1,13}]   ;;  %s1451_s2 = inlined_call_operand.hbm [shape: f32[128,128], index: 2, kind: input, shape index: {}]   ;;  %s1452_s3 = inlined_call_operand.vmem [shape: f32[1,128], index: 3, kind: input, shape index: {}]   ;;  %s1453_s4 = inlined_call_operand.hbm [shape: f32[256,256], index: 4, kind: input, shape index: {}]   ;;  %s1454_s5 = inlined_call_operand.vmem [shape: f32[1,256], index: 5, kind: input, shape index: {}]   ;;  %s1455_s6 = inlined_call_operand.hbm [shape: f32[128,128], index: 6, kind: input, shape index: {}]   ;;  %s1456_s7 = inlined_call_operand.vmem [shape: f32[1,128], index: 7, kind: input, shape index: {}]   ;;  %s1457_s8 = inlined_call_operand.hbm [shape: f32[128,128], index: 8, kind: input, shape index: {}]   ;;  %s1458_s9 = inlined_call_operand.vmem [shape: f32[1,128], index: 9, kind: input, shape index: {}]   ;;  %s1459_s10 = inlined_call_operand.hbm [shape: f32[128,128], index: 10, kind: input, shape index: {}]   ;;  %s1460_s11 = inlined_call_operand.vmem [shape: f32[1,128], index: 11, kind: input, shape index: {}]   ;;  %s1461_s12 = inlined_call_operand.hbm [shape: f32[8,128], index: 12, kind: output, shape index: {0}]   ;;  %s1462_s13 = inlined_call_operand.vmem [shape: f32[8,128], index: 13, kind: output, shape index: {1}, may-alias: {1,13}]  }
   0x1   :  { %20 = vsyncpa [#allocation6], 0 }
   0x2   :  { %21 = vsyncpa [#allocation9], 0 }
   0x3   :  { %22 = vsyncpa [#allocation4], 0  ;;  %s1213_s25 = smov [#allocation5]   ;;  %s1073_s29 = scalar_lea.hbm %s1453_s4, 8192 }
   0x4   :  { %s46_s26 = sshll.u32 %s1213_s25, 4  ;;  %p1074_p0 = scmp.ne.s32.totalorder %s1453_s4, %s1073_s29  ;;  %s47_s26 = int_to_ptr.vmem [resolvable:$true] %s46_s26 }
   0x5   :  { %p1077_p1 = scmp.lt.u32.totalorder %s1073_s29, %s1453_s4 }
   0x7   :  { %p1079_p2 = pnand %p1077_p1, %p1074_p0 }
   0x9   :  { %1082 = shalt.err (!%p1079_p2)
}
   0xa   :  { %s1083_s17 = scalar_lea.vmem %s47_s26, 8192  ;;  %p1088_p4 = scmp.lt.s32.totalorder %s47_s26, %s47_s26 }
   0xb   :  { %p1084_p3 = scmp.ne.s32.totalorder %s47_s26, %s1083_s17  ;;  %p1089_p5 = scmp.lt.s32.totalorder %s1083_s17, %s1083_s17 }
   0xd   :  { %p1090_p6 = por %p1089_p5, %p1088_p4 }
   0xf   :  { %p1091_p7 = pnand %p1090_p6, %p1084_p3 }
  0x11   :  { %1094 = shalt.err (!%p1091_p7)
}
  0x12   :  { %s1214_s18 = smov 256   ;;  %s1215_s19 = smov 16  }
  0x13   :  { %52 = dma.hbm_to_vmem [thread:$0]  %s1453_s4, 8192, %s47_s26, [#allocation6], %s1214_s18, %s1214_s18, %s1215_s19  }
  0x14   :  { %s1216_s22 = smov [#allocation8]   ;;  %s1217_s24 = smov [#allocation2]  }
  0x15   :  { %s74_s23 = sshll.u32 %s1216_s22, 4  ;;  %s32_s25 = sshll.u32 %s1217_s24, 4  ;;  %s75_s23 = int_to_ptr.vmem [resolvable:$true] %s74_s23  ;;  %s33_s25 = int_to_ptr.vmem [resolvable:$true] %s32_s25 }
  0x16   :  { %s1095_s29 = scalar_lea.hbm %s1457_s8, 2048 }
  0x17   :  { %p1096_p8 = scmp.ne.s32.totalorder %s1457_s8, %s1095_s29  ;;  %p1099_p9 = scmp.lt.u32.totalorder %s1095_s29, %s1457_s8 }
  0x19   :  { %p1101_p10 = pnand %p1099_p9, %p1096_p8 }
  0x1b   :  { %1104 = shalt.err (!%p1101_p10)
}
  0x1c   :  { %s1105_s4 = scalar_lea.vmem %s75_s23, 2048  ;;  %p1110_p12 = scmp.lt.s32.totalorder %s75_s23, %s75_s23 }
  0x1d   :  { %p1106_p11 = scmp.ne.s32.totalorder %s75_s23, %s1105_s4  ;;  %p1111_p13 = scmp.lt.s32.totalorder %s1105_s4, %s1105_s4 }
  0x1f   :  { %p1112_p0 = por %p1111_p13, %p1110_p12 }
  0x21   :  { %p1113_p1 = pnand %p1112_p0, %p1106_p11 }
  0x23   :  { %1116 = shalt.err (!%p1113_p1)
}
  0x24   :  { %s1218_s26 = smov 128   ;;  %s1219_s17 = smov 8  }
  0x25   :  { %80 = dma.hbm_to_vmem [thread:$0]  %s1457_s8, 2048, %s75_s23, [#allocation9], %s1218_s26, %s1218_s26, %s1219_s17  }
  0x26   :  { %s1117_s22 = scalar_lea.hbm %s1451_s2, 2048 }
  0x27   :  { %p1118_p2 = scmp.ne.s32.totalorder %s1451_s2, %s1117_s22  ;;  %p1121_p3 = scmp.lt.u32.totalorder %s1117_s22, %s1451_s2 }
  0x29   :  { %p1123_p4 = pnand %p1121_p3, %p1118_p2 }
  0x2b   :  { %1126 = shalt.err (!%p1123_p4)
}
  0x2c   :  { %s1127_s30 = scalar_lea.vmem %s33_s25, 2048  ;;  %p1132_p6 = scmp.lt.s32.totalorder %s33_s25, %s33_s25 }
  0x2d   :  { %p1128_p5 = scmp.ne.s32.totalorder %s33_s25, %s1127_s30  ;;  %p1133_p7 = scmp.lt.s32.totalorder %s1127_s30, %s1127_s30 }
  0x2f   :  { %p1134_p8 = por %p1133_p7, %p1132_p6 }
  0x31   :  { %p1135_p9 = pnand %p1134_p8, %p1128_p5 }
  0x33   :  { %1138 = shalt.err (!%p1135_p9)
}
  0x34   :  { %38 = dma.hbm_to_vmem [thread:$0]  %s1451_s2, 2048, %s33_s25, [#allocation3], %s1218_s26, %s1218_s26, %s1219_s17  }
  0x35   :  { %s1220_s14 = smov [#allocation7]   ;;  %s1221_s16 = smov [#allocation10]  }
  0x36   :  { %s60_s15 = sshll.u32 %s1220_s14, 4  ;;  %s88_s4 = sshll.u32 %s1221_s16, 4  ;;  %s61_s15 = int_to_ptr.vmem [resolvable:$true] %s60_s15  ;;  %s89_s4 = int_to_ptr.vmem [resolvable:$true] %s88_s4 }
  0x37   :  { %s1139_s20 = scalar_lea.hbm %s1455_s6, 2048 }
  0x38   :  { %p1140_p10 = scmp.ne.s32.totalorder %s1455_s6, %s1139_s20  ;;  %p1143_p11 = scmp.lt.u32.totalorder %s1139_s20, %s1455_s6 }
  0x3a   :  { %p1145_p12 = pnand %p1143_p11, %p1140_p10 }
  0x3c   :  { %1148 = shalt.err (!%p1145_p12)
}
  0x3d   :  { %s1149_s2 = scalar_lea.vmem %s61_s15, 2048  ;;  %p1154_p0 = scmp.lt.s32.totalorder %s61_s15, %s61_s15 }
  0x3e   :  { %p1150_p13 = scmp.ne.s32.totalorder %s61_s15, %s1149_s2  ;;  %p1155_p1 = scmp.lt.s32.totalorder %s1149_s2, %s1149_s2 }
  0x40   :  { %p1156_p2 = por %p1155_p1, %p1154_p0 }
  0x42   :  { %p1157_p3 = pnand %p1156_p2, %p1150_p13 }
  0x44   :  { %1160 = shalt.err (!%p1157_p3)
}
  0x45   :  { %66 = dma.hbm_to_vmem [thread:$0]  %s1455_s6, 2048, %s61_s15, [#allocation6], %s1218_s26, %s1218_s26, %s1219_s17  }
  0x46   :  { %s1161_s8 = scalar_lea.hbm %s1459_s10, 2048 }
  0x47   :  { %p1162_p4 = scmp.ne.s32.totalorder %s1459_s10, %s1161_s8  ;;  %p1165_p5 = scmp.lt.u32.totalorder %s1161_s8, %s1459_s10 }
  0x49   :  { %p1167_p6 = pnand %p1165_p5, %p1162_p4 }
  0x4b   :  { %1170 = shalt.err (!%p1167_p6)
}
  0x4c   :  { %s1171_s19 = scalar_lea.vmem %s89_s4, 2048  ;;  %p1176_p8 = scmp.lt.s32.totalorder %s89_s4, %s89_s4 }
  0x4d   :  { %p1172_p7 = scmp.ne.s32.totalorder %s89_s4, %s1171_s19  ;;  %p1177_p9 = scmp.lt.s32.totalorder %s1171_s19, %s1171_s19 }
  0x4f   :  { %p1178_p10 = por %p1177_p9, %p1176_p8 }
  0x51   :  { %p1179_p11 = pnand %p1178_p10, %p1172_p7 }
  0x53   :  { %1182 = shalt.err (!%p1179_p11)
}
  0x54   :  { %94 = dma.hbm_to_vmem [thread:$0]  %s1459_s10, 2048, %s89_s4, [#allocation9], %s1218_s26, %s1218_s26, %s1219_s17  }
  0x55   :  { %1205 = dma.done.wait [#allocation3], 2048  }
  0x56   :  { %1206 = vsyncadd [#allocation3], 4294965248 }
  0x57   :  { %1207 = dma.done.wait [#allocation6], 10240  }
  0x58   :  { %1208 = vsyncadd [#allocation6], 4294957056 }
  0x59   :  { %1209 = dma.done.wait [#allocation9], 4096  }
  0x5a   :  { %1210 = vsyncadd [#allocation9], 4294963200  ;;  %v1222_v0 = vmov 0.0|0.0   ;;  %vm1223_vm0 = vmmov 0   ;;  %v1224_v1 = vmov 0.0   ;;  %v113_v2 = vld [vmem:[#allocation2] sm:$0xff] }
  0x5b   :  { %890 = vmatprep.subr.bf16.mxu0 %v1222_v0  ;;  %782 = vmatprep.mubr.msk.f32.mxu0 %vm1223_vm0, %v1224_v1  ;;  %v114_v3 = vld [vmem:[#allocation2 + $0x8] sm:$0xff]  ;;  %v115_v4 = vld [vmem:[#allocation2 + $0x10] sm:$0xff]  ;;  %v116_v6 = vld [vmem:[#allocation2 + $0x18] sm:$0xff]  ;;  %s1225_s25 = smov [#allocation11]  }
  0x5c   :  { %v891_v5 = vpack.c.bf16 %v114_v3, %v113_v2  ;;  %v894_v7 = vpack.c.bf16 %v116_v6, %v115_v4  ;;  %v117_v8 = vld [vmem:[#allocation2 + $0x20] sm:$0xff]  ;;  %v118_v9 = vld [vmem:[#allocation2 + $0x28] sm:$0xff]  ;;  %v119_v11 = vld [vmem:[#allocation2 + $0x30] sm:$0xff]  ;;  %s661_s28 = sshll.u32 %s1225_s25, 4  ;;  %s662_s28 = int_to_ptr.vmem [resolvable:$true] %s661_s28 }
  0x5d   :  { %v209_v10 = vld [vmem:[#allocation5 + $0x8] sm:$0xff]  ;;  %v120_v12 = vld [vmem:[#allocation2 + $0x38] sm:$0xff]  ;;  %v208_v14 = vld [vmem:[#allocation5] sm:$0xff]  ;;  %v897_v16 = vpack.c.bf16 %v118_v9, %v117_v8  ;;  %s1183_s29 = scalar_lea.vmem %s662_s28, 128  ;;  %p1188_p13 = scmp.lt.s32.totalorder %s662_s28, %s662_s28 }
  0x5e   :  { %892 = vmatpush3.bf16.msra.mxu0 %v891_v5  ;;  %v211_v13 = vld [vmem:[#allocation5 + $0x18] sm:$0xff]  ;;  %v210_v15 = vld [vmem:[#allocation5 + $0x10] sm:$0xff]  ;;  %v213_v19 = vld [vmem:[#allocation5 + $0x28] sm:$0xff]  ;;  %v900_v27 = vpack.c.bf16 %v120_v12, %v119_v11  ;;  %p1184_p12 = scmp.ne.s32.totalorder %s662_s28, %s1183_s29  ;;  %p1189_p0 = scmp.lt.s32.totalorder %s1183_s29, %s1183_s29 }
  0x5f   :  { %893 = vmatprep.subr.bf16.mxu0 %v1222_v0  ;;  %v914_v17 = vpack.c.bf16 %v211_v13, %v209_v10  ;;  %v916_v18 = vpack.c.bf16 %v210_v15, %v208_v14  ;;  %v215_v20 = vld [vmem:[#allocation5 + $0x38] sm:$0xff]  ;;  %v212_v21 = vld [vmem:[#allocation5 + $0x20] sm:$0xff]  ;;  %v214_v23 = vld [vmem:[#allocation5 + $0x30] sm:$0xff] }
  0x60   :  { %v918_v22 = vpack.c.bf16 %v215_v20, %v213_v19  ;;  %v217_v24 = vld [vmem:[#allocation5 + $0x48] sm:$0xff]  ;;  %v219_v25 = vld [vmem:[#allocation5 + $0x58] sm:$0xff]  ;;  %v920_v26 = vpack.c.bf16 %v214_v23, %v212_v21  ;;  %v121_v28 = vld [vmem:[#allocation2 + $0x40] sm:$0xff]  ;;  %p1190_p1 = por %p1189_p0, %p1188_p13 }
  0x61   :  { %915 = vmatprep.subr.bf16.mxu1 %v914_v17  ;;  %v922_v29 = vpack.c.bf16 %v219_v25, %v217_v24  ;;  %v216_v30 = vld [vmem:[#allocation5 + $0x40] sm:$0xff]  ;;  %v218_v31 = vld [vmem:[#allocation5 + $0x50] sm:$0xff]  ;;  %v122_v32 = vld [vmem:[#allocation2 + $0x48] sm:$0xff] }
  0x62   :  { %895 = vmatpush3.bf16.msra.mxu0 %v894_v7  ;;  %917 = vmatpush1.bf16.msra.mxu1 %v916_v18  ;;  %v221_v33 = vld [vmem:[#allocation5 + $0x68] sm:$0xff]  ;;  %v223_v34 = vld [vmem:[#allocation5 + $0x78] sm:$0xff]  ;;  %v924_v35 = vpack.c.bf16 %v218_v31, %v216_v30  ;;  %v903_v36 = vpack.c.bf16 %v122_v32, %v121_v28  ;;  %v123_v37 = vld [vmem:[#allocation2 + $0x50] sm:$0xff]  ;;  %p1191_p2 = pnand %p1190_p1, %p1184_p12 }
  0x63   :  { %896 = vmatprep.subr.bf16.mxu0 %v1222_v0  ;;  %919 = vmatprep.subr.bf16.mxu1 %v918_v22  ;;  %v926_v38 = vpack.c.bf16 %v223_v34, %v221_v33  ;;  %v220_v39 = vld [vmem:[#allocation5 + $0x60] sm:$0xff]  ;;  %v222_v40 = vld [vmem:[#allocation5 + $0x70] sm:$0xff]  ;;  %v124_v41 = vld [vmem:[#allocation2 + $0x58] sm:$0xff] }
  0x64   :  { %v225_v42 = vld [vmem:[#allocation5 + $0x88] sm:$0xff]  ;;  %v227_v43 = vld [vmem:[#allocation5 + $0x98] sm:$0xff]  ;;  %v928_v44 = vpack.c.bf16 %v222_v40, %v220_v39  ;;  %v906_v45 = vpack.c.bf16 %v124_v41, %v123_v37  ;;  %v125_v46 = vld [vmem:[#allocation2 + $0x60] sm:$0xff] }
  0x65   :  { %v930_v47 = vpack.c.bf16 %v227_v43, %v225_v42  ;;  %v224_v48 = vld [vmem:[#allocation5 + $0x80] sm:$0xff]  ;;  %v226_v49 = vld [vmem:[#allocation5 + $0x90] sm:$0xff]  ;;  %v126_v50 = vld [vmem:[#allocation2 + $0x68] sm:$0xff] }
  0x66   :  { %898 = vmatpush3.bf16.msra.mxu0 %v897_v16  ;;  %921 = vmatpush1.bf16.msra.mxu1 %v920_v26  ;;  %v229_v51 = vld [vmem:[#allocation5 + $0xa8] sm:$0xff]  ;;  %v231_v52 = vld [vmem:[#allocation5 + $0xb8] sm:$0xff]  ;;  %v932_v53 = vpack.c.bf16 %v226_v49, %v224_v48  ;;  %v909_v54 = vpack.c.bf16 %v126_v50, %v125_v46  ;;  %v127_v55 = vld [vmem:[#allocation2 + $0x70] sm:$0xff] }
  0x67   :  { %899 = vmatprep.subr.bf16.mxu0 %v1222_v0  ;;  %923 = vmatprep.subr.bf16.mxu1 %v922_v29  ;;  %v934_v56 = vpack.c.bf16 %v231_v52, %v229_v51  ;;  %v228_v57 = vld [vmem:[#allocation5 + $0xa0] sm:$0xff]  ;;  %v230_v58 = vld [vmem:[#allocation5 + $0xb0] sm:$0xff]  ;;  %v128_v59 = vld [vmem:[#allocation2 + $0x78] sm:$0xff] }
  0x68   :  { %v233_v60 = vld [vmem:[#allocation5 + $0xc8] sm:$0xff]  ;;  %v235_v61 = vld [vmem:[#allocation5 + $0xd8] sm:$0xff]  ;;  %v936_v62 = vpack.c.bf16 %v230_v58, %v228_v57  ;;  %v912_v63 = vpack.c.bf16 %v128_v59, %v127_v55  ;;  %v232_v3 = vld [vmem:[#allocation5 + $0xc0] sm:$0xff] }
  0x69   :  { %v938_v2 = vpack.c.bf16 %v235_v61, %v233_v60  ;;  %v234_v4 = vld [vmem:[#allocation5 + $0xd0] sm:$0xff]  ;;  %v237_v5 = vld [vmem:[#allocation5 + $0xe8] sm:$0xff]  ;;  %v239_v6 = vld [vmem:[#allocation5 + $0xf8] sm:$0xff] }
  0x6a   :  { %901 = vmatpush3.bf16.msra.mxu0 %v900_v27  ;;  %925 = vmatpush1.bf16.msra.mxu1 %v924_v35  ;;  %v367_v7 = vld [vmem:[#allocation7] sm:$0xff]  ;;  %v368_v8 = vld [vmem:[#allocation7 + $0x8] sm:$0xff]  ;;  %v940_v10 = vpack.c.bf16 %v234_v4, %v232_v3  ;;  %v942_v11 = vpack.c.bf16 %v239_v6, %v237_v5  ;;  %v238_v13 = vld [vmem:[#allocation5 + $0xf0] sm:$0xff] }
  0x6b   :  { %902 = vmatprep.subr.bf16.mxu0 %v1222_v0  ;;  %927 = vmatprep.subr.bf16.mxu1 %v926_v38  ;;  %v112_v9 = vld [vmem:[%s1449_s0] sm:$0xff]  ;;  %v241_v14 = vld [vmem:[#allocation5 + $0x108] sm:$0xff]  ;;  %v979_v15 = vpack.c.bf16 %v368_v8, %v367_v7  ;;  %v243_v16 = vld [vmem:[#allocation5 + $0x118] sm:$0xff] }
  0x6c   :  { %v236_v12 = vld [vmem:[#allocation5 + $0xe0] sm:$0xff]  ;;  %v369_v17 = vld [vmem:[#allocation7 + $0x10] sm:$0xff]  ;;  %v370_v18 = vld [vmem:[#allocation7 + $0x18] sm:$0xff]  ;;  %v946_v20 = vpack.c.bf16 %v243_v16, %v241_v14 }
  0x6d   :  { %v944_v19 = vpack.c.bf16 %v238_v13, %v236_v12  ;;  %v240_v21 = vld [vmem:[#allocation5 + $0x100] sm:$0xff]  ;;  %v242_v22 = vld [vmem:[#allocation5 + $0x110] sm:$0xff]  ;;  %v245_v23 = vld [vmem:[#allocation5 + $0x128] sm:$0xff]  ;;  %v982_v24 = vpack.c.bf16 %v370_v18, %v369_v17 }
  0x6e   :  { %904 = vmatpush3.bf16.msra.mxu0 %v903_v36  ;;  %929 = vmatpush1.bf16.msra.mxu1 %v928_v44  ;;  %v247_v25 = vld [vmem:[#allocation5 + $0x138] sm:$0xff]  ;;  %v371_v26 = vld [vmem:[#allocation7 + $0x20] sm:$0xff]  ;;  %v372_v27 = vld [vmem:[#allocation7 + $0x28] sm:$0xff]  ;;  %v948_v28 = vpack.c.bf16 %v242_v22, %v240_v21 }
  0x6f   :  { %905 = vmatprep.subr.bf16.mxu0 %v1222_v0  ;;  %931 = vmatprep.subr.bf16.mxu1 %v930_v47  ;;  %v950_v29 = vpack.c.bf16 %v247_v25, %v245_v23  ;;  %v244_v30 = vld [vmem:[#allocation5 + $0x120] sm:$0xff]  ;;  %v246_v31 = vld [vmem:[#allocation5 + $0x130] sm:$0xff]  ;;  %v249_v32 = vld [vmem:[#allocation5 + $0x148] sm:$0xff]  ;;  %v985_v33 = vpack.c.bf16 %v372_v27, %v371_v26 }
  0x70   :  { %v251_v34 = vld [vmem:[#allocation5 + $0x158] sm:$0xff]  ;;  %v373_v35 = vld [vmem:[#allocation7 + $0x30] sm:$0xff]  ;;  %v952_v37 = vpack.c.bf16 %v246_v31, %v244_v30  ;;  %v248_v39 = vld [vmem:[#allocation5 + $0x140] sm:$0xff] }
  0x71   :  { %v374_v36 = vld [vmem:[#allocation7 + $0x38] sm:$0xff]  ;;  %v954_v38 = vpack.c.bf16 %v251_v34, %v249_v32  ;;  %v250_v40 = vld [vmem:[#allocation5 + $0x150] sm:$0xff]  ;;  %v253_v41 = vld [vmem:[#allocation5 + $0x168] sm:$0xff] }
  0x72   :  { %907 = vmatpush3.bf16.msra.mxu0 %v906_v45  ;;  %933 = vmatpush1.bf16.msra.mxu1 %v932_v53  ;;  %v988_v42 = vpack.c.bf16 %v374_v36, %v373_v35  ;;  %v255_v43 = vld [vmem:[#allocation5 + $0x178] sm:$0xff]  ;;  %v375_v44 = vld [vmem:[#allocation7 + $0x40] sm:$0xff]  ;;  %v376_v45 = vld [vmem:[#allocation7 + $0x48] sm:$0xff]  ;;  %v956_v46 = vpack.c.bf16 %v250_v40, %v248_v39 }
  0x73   :  { %908 = vmatprep.subr.bf16.mxu0 %v1222_v0  ;;  %935 = vmatprep.subr.bf16.mxu1 %v934_v56  ;;  %v958_v47 = vpack.c.bf16 %v255_v43, %v253_v41  ;;  %v252_v48 = vld [vmem:[#allocation5 + $0x160] sm:$0xff]  ;;  %v254_v49 = vld [vmem:[#allocation5 + $0x170] sm:$0xff]  ;;  %v257_v50 = vld [vmem:[#allocation5 + $0x188] sm:$0xff]  ;;  %v991_v51 = vpack.c.bf16 %v376_v45, %v375_v44 }
  0x74   :  { %v259_v52 = vld [vmem:[#allocation5 + $0x198] sm:$0xff]  ;;  %v377_v53 = vld [vmem:[#allocation7 + $0x50] sm:$0xff]  ;;  %v960_v55 = vpack.c.bf16 %v254_v49, %v252_v48  ;;  %v256_v57 = vld [vmem:[#allocation5 + $0x180] sm:$0xff] }
  0x75   :  { %v962_v56 = vpack.c.bf16 %v259_v52, %v257_v50  ;;  %v258_v58 = vld [vmem:[#allocation5 + $0x190] sm:$0xff]  ;;  %v261_v59 = vld [vmem:[#allocation5 + $0x1a8] sm:$0xff]  ;;  %v263_v61 = vld [vmem:[#allocation5 + $0x1b8] sm:$0xff] }
  0x76   :  { %910 = vmatpush3.bf16.msra.mxu0 %v909_v54  ;;  %937 = vmatpush1.bf16.msra.mxu1 %v936_v62  ;;  %v378_v54 = vld [vmem:[#allocation7 + $0x58] sm:$0xff]  ;;  %v379_v62 = vld [vmem:[#allocation7 + $0x60] sm:$0xff]  ;;  %v966_v3 = vpack.c.bf16 %v263_v61, %v261_v59  ;;  %v262_v5 = vld [vmem:[#allocation5 + $0x1b0] sm:$0xff] }
  0x77   :  { %911 = vmatprep.subr.bf16.mxu0 %v1222_v0  ;;  %939 = vmatprep.subr.bf16.mxu1 %v938_v2  ;;  %v994_v60 = vpack.c.bf16 %v378_v54, %v377_v53  ;;  %v964_v2 = vpack.c.bf16 %v258_v58, %v256_v57  ;;  %v260_v4 = vld [vmem:[#allocation5 + $0x1a0] sm:$0xff]  ;;  %v265_v7 = vld [vmem:[#allocation5 + $0x1c8] sm:$0xff]  ;;  %v267_v8 = vld [vmem:[#allocation5 + $0x1d8] sm:$0xff] }
  0x78   :  { %v266_v12 = vld [vmem:[#allocation5 + $0x1d0] sm:$0xff]  ;;  %v269_v14 = vld [vmem:[#allocation5 + $0x1e8] sm:$0xff]  ;;  %v382_v18 = vld [vmem:[#allocation7 + $0x78] sm:$0xff] }
  0x79   :  { %v381_v16 = vld [vmem:[#allocation7 + $0x70] sm:$0xff]  ;;  %v1394_v23 = vld [vmem:[%s1450_s1] sm:$0xff]  ;;  %v384_v26 = vld [vmem:[#allocation8 + $0x8] sm:$0xff] }
  0x7a   :  { %913 = vmatpush3.bf16.msra.mxu0 %v912_v63  ;;  %941 = vmatpush1.bf16.msra.mxu1 %v940_v10  ;;  %v380_v63 = vld [vmem:[#allocation7 + $0x68] sm:$0xff]  ;;  %v970_v10 = vpack.c.bf16 %v267_v8, %v265_v7  ;;  %v1000_v21 = vpack.c.bf16 %v382_v18, %v381_v16  ;;  %v383_v25 = vld [vmem:[#allocation8] sm:$0xff]  ;;  %v385_v32 = vld [vmem:[#allocation8 + $0x10] sm:$0xff] }
  0x7b   :  { %978 = vmatprep.subr.bf16.mxu0 %v1222_v0  ;;  %943 = vmatprep.subr.bf16.mxu1 %v942_v11  ;;  %v997_v6 = vpack.c.bf16 %v380_v63, %v379_v62  ;;  %v264_v11 = vld [vmem:[#allocation5 + $0x1c0] sm:$0xff]  ;;  %v1003_v30 = vpack.c.bf16 %v384_v26, %v383_v25  ;;  %v388_v36 = vld [vmem:[#allocation8 + $0x28] sm:$0xff]  ;;  %v390_v39 = vld [vmem:[#allocation8 + $0x38] sm:$0xff] }
  0x7c   :  { %v972_v13 = vpack.c.bf16 %v266_v12, %v264_v11  ;;  %348 = vmatprep.mubr.f32.mxu1 %v1394_v23  ;;  %v387_v35 = vld [vmem:[#allocation8 + $0x20] sm:$0xff]  ;;  %v393_v44 = vld [vmem:[#allocation8 + $0x50] sm:$0xff]  ;;  %v394_v45 = vld [vmem:[#allocation8 + $0x58] sm:$0xff] }
  0x7d   :  { %783 = vmatmul.mubr.f32.vlgmr.msra.gmra.mrb[0].mxu0 %v112_v9  ;;  %v968_v9 = vpack.c.bf16 %v262_v5, %v260_v4  ;;  %v391_v41 = vld [vmem:[#allocation8 + $0x40] sm:$0xff]  ;;  %v397_v49 = vld [vmem:[#allocation8 + $0x70] sm:$0xff]  ;;  %v398_v50 = vld [vmem:[#allocation8 + $0x78] sm:$0xff] }
  0x7e   :  { %980 = vmatpush3.bf16.msra.mxu0 %v979_v15  ;;  %817 = vmatprep.mubr.msk.f32.mxu0 %vm1223_vm0, %v1224_v1  ;;  %v271_v15 = vld [vmem:[#allocation5 + $0x1f8] sm:$0xff]  ;;  %v561_v52 = vld [vmem:[#allocation10] sm:$0xff]  ;;  %v562_v53 = vld [vmem:[#allocation10 + $0x8] sm:$0xff] }
  0x7f   :  { %981 = vmatprep.subr.bf16.mxu0 %v1222_v0  ;;  %945 = vmatpush1.bf16.msra.mxu1 %v944_v19  ;;  %v974_v17 = vpack.c.bf16 %v271_v15, %v269_v14  ;;  %v268_v19 = vld [vmem:[#allocation5 + $0x1e0] sm:$0xff]  ;;  %v563_v54 = vld [vmem:[#allocation10 + $0x10] sm:$0xff]  ;;  %v566_v59 = vld [vmem:[#allocation10 + $0x28] sm:$0xff]  ;;  %v274_v14 = vlaneseq }
  0x80   :  { %947 = vmatprep.subr.bf16.mxu1 %v946_v20  ;;  %v270_v20 = vld [vmem:[#allocation5 + $0x1f0] sm:$0xff]  ;;  %v565_v58 = vld [vmem:[#allocation10 + $0x20] sm:$0xff]  ;;  %v568_v62 = vld [vmem:[#allocation10 + $0x38] sm:$0xff] }
  0x81   :  { %v976_v22 = vpack.c.bf16 %v270_v20, %v268_v19  ;;  %v567_v61 = vld [vmem:[#allocation10 + $0x30] sm:$0xff]  ;;  %v573_v8 = vld [vmem:[#allocation10 + $0x60] sm:$0xff]  ;;  %v576_v12 = vld [vmem:[#allocation10 + $0x78] sm:$0xff]  ;;  %v275_v15 = vshrl.u32 %v274_v14, 7 }
  0x82   :  { %983 = vmatpush3.bf16.msra.mxu0 %v982_v24  ;;  %v676_v24 = vld [vmem:[%s1452_s3] ss:$0 sm:$0xff]  ;;  %v1036_v63 = vpack.c.bf16 %v568_v62, %v567_v61  ;;  %v571_v5 = vld [vmem:[#allocation10 + $0x50] sm:$0xff] }
  0x83   :  { %984 = vmatprep.subr.bf16.mxu0 %v1222_v0  ;;  %949 = vmatpush1.bf16.msra.mxu1 %v948_v28  ;;  %v575_v11 = vld [vmem:[#allocation10 + $0x70] sm:$0xff]  ;;  %v276_v16 = vsub.s32 0, %v275_v15  ;;  %v280_v25 = vsub.s32 1, %v275_v15 }
  0x84   :  { %951 = vmatprep.subr.bf16.mxu1 %v950_v29 }
  0x86   :  { %986 = vmatpush3.bf16.msra.mxu0 %v985_v33  ;;  %v386_v33 = vld [vmem:[#allocation8 + $0x18] sm:$0xff] }
  0x87   :  { %987 = vmatprep.subr.bf16.mxu0 %v1222_v0  ;;  %953 = vmatpush1.bf16.msra.mxu1 %v952_v37  ;;  %v1006_v34 = vpack.c.bf16 %v386_v33, %v385_v32  ;;  %v1009_v37 = vpack.c.bf16 %v388_v36, %v387_v35  ;;  %v680_v32 = vld [vmem:[%s1458_s9] ss:$0 sm:$0xff] }
  0x88   :  { %955 = vmatprep.subr.bf16.mxu1 %v954_v38  ;;  %v389_v38 = vld [vmem:[#allocation8 + $0x30] sm:$0xff] }
  0x89   :  { %v1012_v40 = vpack.c.bf16 %v390_v39, %v389_v38 }
  0x8a   :  { %989 = vmatpush3.bf16.msra.mxu0 %v988_v42  ;;  %v392_v42 = vld [vmem:[#allocation8 + $0x48] sm:$0xff] }
  0x8b   :  { %990 = vmatprep.subr.bf16.mxu0 %v1222_v0  ;;  %957 = vmatpush1.bf16.msra.mxu1 %v956_v46  ;;  %v1015_v43 = vpack.c.bf16 %v392_v42, %v391_v41  ;;  %v395_v46 = vld [vmem:[#allocation8 + $0x60] sm:$0xff] }
  0x8c   :  { %959 = vmatprep.subr.bf16.mxu1 %v958_v47  ;;  %v396_v47 = vld [vmem:[#allocation8 + $0x68] sm:$0xff] }
  0x8d   :  { %v1021_v48 = vpack.c.bf16 %v396_v47, %v395_v46  ;;  %v681_v47 = vld [vmem:[%s1460_s11] ss:$0 sm:$0xff] }
  0x8e   :  { %992 = vmatpush3.bf16.msra.mxu0 %v991_v51  ;;  %v1024_v51 = vpack.c.bf16 %v398_v50, %v397_v49 }
  0x8f   :  { %993 = vmatprep.subr.bf16.mxu0 %v1222_v0  ;;  %961 = vmatpush1.bf16.msra.mxu1 %v960_v55  ;;  %v1027_v55 = vpack.c.bf16 %v562_v53, %v561_v52 }
  0x90   :  { %963 = vmatprep.subr.bf16.mxu1 %v962_v56  ;;  %v564_v56 = vld [vmem:[#allocation10 + $0x18] sm:$0xff] }
  0x91   :  { %v1030_v57 = vpack.c.bf16 %v564_v56, %v563_v54 }
  0x92   :  { %995 = vmatpush3.bf16.msra.mxu0 %v994_v60  ;;  %v1033_v60 = vpack.c.bf16 %v566_v59, %v565_v58 }
  0x93   :  { %996 = vmatprep.subr.bf16.mxu0 %v1222_v0  ;;  %965 = vmatpush1.bf16.msra.mxu1 %v964_v2  ;;  %v569_v2 = vld [vmem:[#allocation10 + $0x40] sm:$0xff] }
  0x94   :  { %967 = vmatprep.subr.bf16.mxu1 %v966_v3  ;;  %v570_v3 = vld [vmem:[#allocation10 + $0x48] sm:$0xff] }
  0x95   :  { %v1039_v4 = vpack.c.bf16 %v570_v3, %v569_v2 }
  0x96   :  { %998 = vmatpush3.bf16.msra.mxu0 %v997_v6  ;;  %v572_v6 = vld [vmem:[#allocation10 + $0x58] sm:$0xff] }
  0x97   :  { %999 = vmatprep.subr.bf16.mxu0 %v1222_v0  ;;  %969 = vmatpush1.bf16.msra.mxu1 %v968_v9  ;;  %v1042_v7 = vpack.c.bf16 %v572_v6, %v571_v5  ;;  %v574_v9 = vld [vmem:[#allocation10 + $0x68] sm:$0xff] }
  0x98   :  { %971 = vmatprep.subr.bf16.mxu1 %v970_v10  ;;  %v1045_v10 = vpack.c.bf16 %v574_v9, %v573_v8 }
  0x9a   :  { %1001 = vmatpush3.bf16.msra.mxu0 %v1000_v21 }
  0x9b   :  { %973 = vmatpush1.bf16.msra.mxu1 %v972_v13  ;;  %1002 = vmatprep.subr.bf16.mxu0 %v1222_v0  ;;  %v1048_v13 = vpack.c.bf16 %v576_v12, %v575_v11 }
  0x9c   :  { %975 = vmatprep.subr.bf16.mxu1 %v974_v17  ;;  %v272_v17 = vld [vmem:[%s1454_s5] sm:$0x3] }
  0x9d   :  { %v277_v18 = vrot.slane %v272_v17, %v276_v16 }
  0x9f   :  { %977 = vmatpush1.bf16.msra.mxu1 %v976_v22 }
  0xa0   :  { %1026 = vmatprep.subr.bf16.mxu1 %v1222_v0 }
 0x150   :  { %v202_v27 = vpop.f32.mrb[0].mxu0 }
 0x151   :  { %v203_v28 = vadd.f32 %v676_v24, %v202_v27  ;;  %v784_v29 = vpop.f32.mrb[1].mxu0  ;;  %v281_v27 = vrot.slane %v272_v17, %v280_v25 }
 0x153   :  { %v206_v31 = vmax.f32 %v203_v28, 0.0 }
 0x155   :  { %349 = vmatmul.mubr.f32.vlgmr.msra.gmra.mrb[0].mxu1 %v206_v31  ;;  %818 = vmatmul.mubr.f32.vlgmr.msra.gmra.mrb[2].mxu0 %v206_v31 }
 0x156   :  { %1004 = vmatpush3.bf16.msra.mxu0 %v1003_v30  ;;  %852 = vmatprep.mubr.msk.f32.mxu0 %vm1223_vm0, %v1224_v1 }
 0x157   :  { %1005 = vmatprep.subr.bf16.mxu0 %v1222_v0  ;;  %887 = vmatprep.mubr.msk.f32.mxu1 %vm1223_vm0, %v1224_v1  ;;  %v1018_v1 = vpack.c.bf16 %v394_v45, %v393_v44 }
 0x158   :  { %1028 = vmatpush3.bf16.msra.mxu1 %v1027_v55 }
 0x159   :  { %1029 = vmatprep.subr.bf16.mxu1 %v1222_v0 }
 0x15a   :  { %1007 = vmatpush3.bf16.msra.mxu0 %v1006_v34  ;;  %v679_v34 = vld [vmem:[%s1456_s7] ss:$0 sm:$0xff] }
 0x15b   :  { %1008 = vmatprep.subr.bf16.mxu0 %v1222_v0 }
 0x15c   :  { %1031 = vmatpush3.bf16.msra.mxu1 %v1030_v57 }
 0x15d   :  { %1032 = vmatprep.subr.bf16.mxu1 %v1222_v0 }
 0x15e   :  { %1010 = vmatpush3.bf16.msra.mxu0 %v1009_v37 }
 0x15f   :  { %1011 = vmatprep.subr.bf16.mxu0 %v1222_v0 }
 0x160   :  { %1034 = vmatpush3.bf16.msra.mxu1 %v1033_v60 }
 0x161   :  { %1035 = vmatprep.subr.bf16.mxu1 %v1222_v0 }
 0x162   :  { %1013 = vmatpush3.bf16.msra.mxu0 %v1012_v40 }
 0x163   :  { %1014 = vmatprep.subr.bf16.mxu0 %v1222_v0 }
 0x164   :  { %1037 = vmatpush3.bf16.msra.mxu1 %v1036_v63 }
 0x165   :  { %1038 = vmatprep.subr.bf16.mxu1 %v1222_v0 }
 0x166   :  { %1016 = vmatpush3.bf16.msra.mxu0 %v1015_v43 }
 0x167   :  { %1017 = vmatprep.subr.bf16.mxu0 %v1222_v0 }
 0x168   :  { %1040 = vmatpush3.bf16.msra.mxu1 %v1039_v4 }
 0x169   :  { %1041 = vmatprep.subr.bf16.mxu1 %v1222_v0 }
 0x16a   :  { %1019 = vmatpush3.bf16.msra.mxu0 %v1018_v1 }
 0x16b   :  { %1020 = vmatprep.subr.bf16.mxu0 %v1222_v0 }
 0x16c   :  { %1043 = vmatpush3.bf16.msra.mxu1 %v1042_v7 }
 0x16d   :  { %1044 = vmatprep.subr.bf16.mxu1 %v1222_v0 }
 0x16e   :  { %1022 = vmatpush3.bf16.msra.mxu0 %v1021_v48 }
 0x16f   :  { %1023 = vmatprep.subr.bf16.mxu0 %v1222_v0 }
 0x170   :  { %1046 = vmatpush3.bf16.msra.mxu1 %v1045_v10 }
 0x171   :  { %1047 = vmatprep.subr.bf16.mxu1 %v1222_v0 }
 0x172   :  { %1025 = vmatpush3.bf16.msra.mxu0 %v1024_v51 }
 0x174   :  { %1049 = vmatpush3.bf16.msra.mxu1 %v1048_v13 }
 0x175   :  { %853 = vmatmul.mubr.f32.vlgmr.msra.gmra.mrb[4].mxu0 %v1394_v23 }
 0x228   :  { %v350_v19 = vpop.f32.mrb[0].mxu1  ;;  %v472_v20 = vpop.f32.mrb[2].mxu0 }
 0x229   :  { %v351_v21 = vadd.f32 %v350_v19, %v277_v18  ;;  %v352_v22 = vpop.f32.mrb[1].mxu1  ;;  %v819_v24 = vpop.f32.mrb[3].mxu0  ;;  %v473_v39 = vadd.f32 %v679_v34, %v472_v20 }
 0x22a   :  { %v353_v28 = vadd.f32 %v352_v22, %v281_v27 }
 0x22b   :  { %v677_v26 = vmul.f32 -1.442695, %v351_v21 }
 0x22c   :  { %v678_v0 = vmul.f32 -1.442695, %v353_v28 }
 0x22d   :  { %1063 = vpow2.f32 %v677_v26 }
 0x22e   :  { %1065 = vpow2.f32 %v678_v0 }
 0x237   :  { %v1064_v29 = vpop.eup %1063 }
 0x238   :  { %v361_v30 = vadd.f32 1.0, %v1064_v29  ;;  %v1066_v31 = vpop.eup %1065 }
 0x239   :  { %v362_v33 = vadd.f32 1.0, %v1066_v31 }
 0x23a   :  { %1067 = vrcp.f32 %v361_v30 }
 0x23b   :  { %1069 = vrcp.f32 %v362_v33 }
 0x244   :  { %v1068_v38 = vpop.eup %1067 }
 0x245   :  { %v1070_v42 = vpop.eup %1069 }
 0x246   :  { %v556_v43 = vsub.f32 1.0, %v1070_v42  ;;  %v558_v1 = vmul.f32 %v1070_v42, %v1394_v23 }
 0x248   :  { %v549_v35 = vpop.f32.mrb[4].mxu0 }
 0x249   :  { %v550_v36 = vadd.f32 %v680_v32, %v549_v35  ;;  %v854_v37 = vpop.f32.mrb[5].mxu0 }
 0x24b   :  { %v553_v40 = vmul.f32 %v1068_v38, %v550_v36 }
 0x24d   :  { %v554_v41 = vadd.f32 %v553_v40, %v473_v39 }
 0x24f   :  { %1071 = vtanh.f32 %v554_v41 }
 0x259   :  { %v1072_v44 = vpop.eup %1071 }
 0x25a   :  { %v557_v45 = vmul.f32 %v1072_v44, %v556_v43 }
 0x25c   :  { %v559_v46 = vadd.f32 %v558_v1, %v557_v45 }
 0x25e   :  { %560 = vst [vmem:[%s1462_s13] sm:$0xff] %v559_v46  ;;  %888 = vmatmul.mubr.f32.vlgmr.msra.gmra.mrb[2].mxu1 %v559_v46 }
 0x331   :  { %v650_v48 = vpop.f32.mrb[2].mxu1 }
 0x332   :  { %v651_v49 = vadd.f32 %v681_v47, %v650_v48  ;;  %v889_v50 = vpop.f32.mrb[3].mxu1 }
 0x334   :  { %654 = vst [vmem:[#allocation11] sm:$0xff] %v651_v49 }
 0x335   :  { %1194 = shalt.err (!%p1191_p2)
}
 0x336   :  { %s1195_s8 = scalar_lea.hbm %s1461_s12, 128 }
 0x337   :  { %p1196_p3 = scmp.ne.s32.totalorder %s1461_s12, %s1195_s8  ;;  %p1199_p4 = scmp.lt.u32.totalorder %s1195_s8, %s1461_s12 }
 0x339   :  { %p1201_p5 = pnand %p1199_p4, %p1196_p3 }
 0x33b   :  { %1204 = shalt.err (!%p1201_p5)
}
 0x33c   :  { %664 = dma.vmem_to_hbm [thread:$0]  %s662_s28, 128, %s1461_s12, [#allocation4]  }
 0x33d   :  { %1211 = dma.done.wait [#allocation4], 128  }
 0x33e   :  { %1212 = vsyncadd [#allocation4], 4294967168 }
 0x33f   :  { %672 = vsyncpa [#allocation3], 1 }
 0x340   :  { %673 = vsyncpa [#allocation6], 1 }
 0x341   :  { %674 = vsyncpa [#allocation9], 1 }
 0x342   :  { %675 = vsyncpa [#allocation4], 1 }

</bundles_post_ra>
